<compile_context>
chip_gen: v5e
topology: v5e:2x2
jax: 0.10.0
libtpu: 0.0.40
codegen_flags: <defaults>
</compile_context>

<pallas_src>
import functools
import math

import jax
import jax.numpy as jnp
from jax.experimental import pallas as pl
from jax.experimental.pallas import tpu as pltpu


# ---------------------------------------------------------------------------
# Single fused, grid-less kernel: rep-BatchMLP + multi-head attention + output
# projection for ALL batch elements at once.
# ---------------------------------------------------------------------------
def fused_attention_kernel(x_ref, r_ref, w_ref, b_ref, o_ref, *,
                           B, n1, n2, d_x, hidden, d_k, d_v,
                           num_heads, head_size):
    hh = num_heads * head_size

    x = x_ref[...]                      # [B*(n1+n2), d_x]  (ctx rows then tgt rows per batch)
    r = r_ref[...]                      # [B*n1, d_v]

    # Static carve-up of the packed parameter stacks (cheap VMEM views/loads).
    w0 = w_ref[0, :d_x, :hidden]        # [d_x, hidden]
    w1 = w_ref[1, :hidden, :d_k]        # [hidden, d_k]
    wq = w_ref[2, :d_k, :hh]            # [d_k, H*hs]
    wk = w_ref[3, :d_k, :hh]
    wv = w_ref[4, :d_v, :hh]
    wo = w_ref[5, :head_size, :d_v]     # [hs, d_v]
    b0 = b_ref[0:1, :hidden]
    b1 = b_ref[1:2, :d_k]
    bq = b_ref[2:3, :hh]
    bk = b_ref[3:4, :hh]
    bv = b_ref[4:5, :hh]
    bo = b_ref[5:6, :d_v]

    # --- rep == 'mlp': shared BatchMLP applied to all context+target rows of
    # every batch at once (purely row-wise -> a single pair of matmuls).
    h = jnp.maximum(jnp.dot(x, w0, preferred_element_type=jnp.float32) + b0, 0.0)
    kq = jnp.dot(h, w1, preferred_element_type=jnp.float32) + b1        # [B*(n1+n2), d_k]

    # --- all-head projections, one MXU matmul each over every row of both
    # batches (extra rows are wasted-but-free compute; avoids pre-slicing kq).
    qh_all = jnp.dot(kq, wq, preferred_element_type=jnp.float32) + bq   # [B*(n1+n2), H*hs]
    kh_all = jnp.dot(kq, wk, preferred_element_type=jnp.float32) + bk   # [B*(n1+n2), H*hs]
    vh_all = jnp.dot(r, wv, preferred_element_type=jnp.float32) + bv    # [B*n1,      H*hs]

    scale = 1.0 / jnp.sqrt(jnp.float32(head_size))
    for bi in range(B):                          # B=2, statically unrolled
        row0 = bi * (n1 + n2)
        kh = kh_all[row0:row0 + n1, :]           # [n1, H*hs]  (sublane-aligned slice)
        qh = qh_all[row0 + n1:row0 + n1 + n2, :]  # [n2, H*hs]
        vh = vh_all[bi * n1:(bi + 1) * n1, :]    # [n1, H*hs]

        # TODO(synk): if n1/n2/H ever scale up, replace this unrolled per-head
        # loop with a single block-diagonal all-heads matmul (heads stacked on
        # the sublane axis) — not worth the relayout cost at these toy sizes.
        o_sum = jnp.zeros((n2, head_size), jnp.float32)
        for hd in range(num_heads):              # short, statically unrolled
            lo = hd * head_size
            q_h = qh[:, lo:lo + head_size]       # [n2, hs]
            k_h = kh[:, lo:lo + head_size]       # [n1, hs]
            v_h = vh[:, lo:lo + head_size]       # [n1, hs]
            # scores[i, j] = <q_i, k_j> / sqrt(hs)  -> [n2, n1]
            s = jax.lax.dot_general(q_h, k_h, (((1,), (1,)), ((), ())),
                                    preferred_element_type=jnp.float32) * scale
            # softmax over the context axis, numerically stabilized
            s = s - jnp.max(s, axis=-1, keepdims=True)
            p = jnp.exp(s)
            p = p * pl.reciprocal(jnp.sum(p, axis=-1, keepdims=True), approx=True)
            o_sum = o_sum + jnp.dot(p, v_h, preferred_element_type=jnp.float32)

        # Wo/bo are shared across heads: sum_h (o_h@Wo + bo) == (sum_h o_h)@Wo + H*bo
        out_b = (jnp.dot(o_sum, wo, preferred_element_type=jnp.float32)
                 + jnp.float32(num_heads) * bo)                         # [n2, d_v]
        o_ref[bi * n2:(bi + 1) * n2, :] = out_b.astype(o_ref.dtype)


# ---------------------------------------------------------------------------
# Wrapper: pack params, pre-concatenate/flatten activations, one pallas_call.
# ---------------------------------------------------------------------------
def attention_forward(context_x, target_x, r, params, *, num_heads):
    B, n1, d_x = context_x.shape
    _, n2, _ = target_x.shape
    d_v = r.shape[-1]
    hidden = params["mlp_w0"].shape[1]
    d_k = params["mlp_w1"].shape[1]
    hs = d_v // num_heads
    hh = num_heads * hs

    # Pre-concatenate context/target rows and fold batch into the row axis.
    x_flat = jnp.concatenate([context_x, target_x], axis=1).reshape(B * (n1 + n2), d_x)
    r_flat = r.reshape(B * n1, d_v)

    # Pack the 12 parameter tensors into one zero-padded weight stack and one
    # bias stack (collapses 12 input pipelines into 2 small DMAs).
    pr = max(d_x, hidden, d_k, d_v, hs)          # padded in-dim  (32 here)
    pc = max(hidden, d_k, hh, d_v)               # padded out-dim (32 here)

    def pad_w(w):
        return jnp.zeros((pr, pc), jnp.float32).at[:w.shape[0], :w.shape[1]].set(w)

    def pad_b(b):
        return jnp.zeros((1, pc), jnp.float32).at[:, :b.shape[1]].set(b)

    w_stack = jnp.stack([pad_w(params["mlp_w0"]), pad_w(params["mlp_w1"]),
                         pad_w(params["wq"]), pad_w(params["wk"]),
                         pad_w(params["wv"]), pad_w(params["wo"])])        # [6, pr, pc]
    b_stack = jnp.concatenate([pad_b(params["mlp_b0"]), pad_b(params["mlp_b1"]),
                               pad_b(params["bq"]), pad_b(params["bk"]),
                               pad_b(params["bv"]), pad_b(params["bo"])], axis=0)  # [6, pc]

    kernel = functools.partial(
        fused_attention_kernel,
        B=B, n1=n1, n2=n2, d_x=d_x, hidden=hidden, d_k=d_k, d_v=d_v,
        num_heads=num_heads, head_size=hs)

    out_flat = pl.pallas_call(
        kernel,
        out_shape=jax.ShapeDtypeStruct((B * n2, d_v), jnp.float32),
        in_specs=[pl.BlockSpec(memory_space=pltpu.MemorySpace.VMEM)] * 4,
        out_specs=pl.BlockSpec(memory_space=pltpu.MemorySpace.VMEM),
    )(x_flat, r_flat, w_stack, b_stack)

    return out_flat.reshape(B, n2, d_v)


# ---------------------------------------------------------------------------
# Pure-JAX reference (mirrors the PyTorch module's math) for correctness check.
# ---------------------------------------------------------------------------
def attention_forward_ref(context_x, target_x, r, params, *, num_heads):
    def mlp(x):
        h = jnp.maximum(x @ params["mlp_w0"] + params["mlp_b0"][0], 0.0)
        return h @ params["mlp_w1"] + params["mlp_b1"][0]

    k = mlp(context_x)
    q = mlp(target_x)
    d_v = r.shape[-1]
    hs = d_v // num_heads
    rep = 0.0
    for h in range(num_heads):
        sl = slice(h * hs, (h + 1) * hs)
        qh = q @ params["wq"][:, sl] + params["bq"][0, sl]
        kh = k @ params["wk"][:, sl] + params["bk"][0, sl]
        vh = r @ params["wv"][:, sl] + params["bv"][0, sl]
        s = jnp.einsum('bjk,bik->bij', kh, qh) / math.sqrt(hs)
        w = jax.nn.softmax(s, axis=-1)
        o = jnp.einsum('bik,bkj->bij', w, vh)
        rep = rep + (o @ params["wo"] + params["bo"][0])   # bo added per head, as in PyTorch
    return rep


# ---------------------------------------------------------------------------
# Deterministic parameter init (PyTorch-Linear-style uniform ±1/sqrt(fan_in)).
# Per-head weights are stored fused along the output axis: [d, H*hs].
# ---------------------------------------------------------------------------
def init_params(key, d_x, d_k, d_v, hidden, num_heads):
    hs = d_v // num_heads

    def lin(key, fan_in, shape):
        bound = 1.0 / math.sqrt(fan_in)
        return jax.random.uniform(key, shape, jnp.float32, -bound, bound)

    ks = jax.random.split(key, 12)
    return {
        # rep BatchMLP: d_x -> hidden -> d_k
        "mlp_w0": lin(ks[0], d_x, (d_x, hidden)),
        "mlp_b0": lin(ks[1], d_x, (1, hidden)),
        "mlp_w1": lin(ks[2], hidden, (hidden, d_k)),
        "mlp_b1": lin(ks[3], hidden, (1, d_k)),
        # per-head projections, fused over heads along the output axis
        "wq": lin(ks[4], d_k, (d_k, num_heads * hs)),
        "bq": lin(ks[5], d_k, (1, num_heads * hs)),
        "wk": lin(ks[6], d_k, (d_k, num_heads * hs)),
        "bk": lin(ks[7], d_k, (1, num_heads * hs)),
        "wv": lin(ks[8], d_v, (d_v, num_heads * hs)),
        "bv": lin(ks[9], d_v, (1, num_heads * hs)),
        # shared output projection Wo: hs -> d_v
        "wo": lin(ks[10], hs, (hs, d_v)),
        "bo": lin(ks[11], hs, (1, d_v)),
    }


if __name__ == "__main__":
    # Shapes consistent with the module's forward():
    #   context_x: [B, n1, d_x], target_x: [B, n2, d_x], r: [B, n1, d_v]
    B, n1, n2 = 2, 8, 8
    d_x, d_v = 16, 32
    hidden, d_k = 32, 32          # rep-MLP output_sizes = [32, 32]  -> d_k = 32
    num_heads = 4                 # head_size = d_v // num_heads = 8

    root = jax.random.PRNGKey(0)
    k_cx, k_tx, k_r, k_p = jax.random.split(root, 4)
    context_x = jax.random.normal(k_cx, (B, n1, d_x), jnp.float32)
    target_x = jax.random.normal(k_tx, (B, n2, d_x), jnp.float32)
    r = jax.random.normal(k_r, (B, n1, d_v), jnp.float32)
    params = init_params(k_p, d_x, d_k, d_v, hidden, num_heads)

    out = attention_forward(context_x, target_x, r, params, num_heads=num_heads)
    out = jax.block_until_ready(out)

    ref = attention_forward_ref(context_x, target_x, r, params, num_heads=num_heads)
    assert out.shape == (B, n2, d_v), out.shape
    # Tolerance slightly loosened vs 1e-4 to accommodate pl.reciprocal(approx=True)
    # in the softmax normalization (EUP vrcp, ~1e-3-level relative drift).
    assert jnp.allclose(out, ref, atol=5e-3, rtol=5e-3), float(jnp.abs(out - ref).max())

    print("KERNEL_OK")
</pallas_src>

<mosaic_0001>
module attributes {stable_mosaic.version = 11 : i64} {
  func.func @fused_attention_kernel(%arg0: memref<32x16xf32, #tpu.memory_space<vmem>>, %arg1: memref<16x32xf32, #tpu.memory_space<vmem>>, %arg2: memref<6x32x32xf32, #tpu.memory_space<vmem>>, %arg3: memref<6x32xf32, #tpu.memory_space<vmem>>, %arg4: memref<16x32xf32, #tpu.memory_space<vmem>>) attributes {dimension_semantics = [], scalar_prefetch = 0 : i64, scratch_operands = 0 : i64, tpu.core_type = #tpu.core_type<tc>} {
    %c0 = arith.constant 0 : index
    %c0_0 = arith.constant 0 : index
    %0 = vector.load %arg0[%c0, %c0_0] : memref<32x16xf32, #tpu.memory_space<vmem>>, vector<32x16xf32>
    %c0_1 = arith.constant 0 : index
    %c0_2 = arith.constant 0 : index
    %1 = vector.load %arg1[%c0_1, %c0_2] : memref<16x32xf32, #tpu.memory_space<vmem>>, vector<16x32xf32>
    %c0_3 = arith.constant 0 : index
    %c0_4 = arith.constant 0 : index
    %c0_5 = arith.constant 0 : index
    %2 = vector.load %arg2[%c0_3, %c0_4, %c0_5] : memref<6x32x32xf32, #tpu.memory_space<vmem>>, vector<1x16x32xf32>
    %3 = vector.shape_cast %2 : vector<1x16x32xf32> to vector<16x32xf32>
    %c1 = arith.constant 1 : index
    %c0_6 = arith.constant 0 : index
    %c0_7 = arith.constant 0 : index
    %4 = vector.load %arg2[%c1, %c0_6, %c0_7] : memref<6x32x32xf32, #tpu.memory_space<vmem>>, vector<1x32x32xf32>
    %5 = vector.shape_cast %4 : vector<1x32x32xf32> to vector<32x32xf32>
    %c2 = arith.constant 2 : index
    %c0_8 = arith.constant 0 : index
    %c0_9 = arith.constant 0 : index
    %6 = vector.load %arg2[%c2, %c0_8, %c0_9] : memref<6x32x32xf32, #tpu.memory_space<vmem>>, vector<1x32x32xf32>
    %7 = vector.shape_cast %6 : vector<1x32x32xf32> to vector<32x32xf32>
    %c3 = arith.constant 3 : index
    %c0_10 = arith.constant 0 : index
    %c0_11 = arith.constant 0 : index
    %8 = vector.load %arg2[%c3, %c0_10, %c0_11] : memref<6x32x32xf32, #tpu.memory_space<vmem>>, vector<1x32x32xf32>
    %9 = vector.shape_cast %8 : vector<1x32x32xf32> to vector<32x32xf32>
    %c4 = arith.constant 4 : index
    %c0_12 = arith.constant 0 : index
    %c0_13 = arith.constant 0 : index
    %10 = vector.load %arg2[%c4, %c0_12, %c0_13] : memref<6x32x32xf32, #tpu.memory_space<vmem>>, vector<1x32x32xf32>
    %11 = vector.shape_cast %10 : vector<1x32x32xf32> to vector<32x32xf32>
    %c5 = arith.constant 5 : index
    %c0_14 = arith.constant 0 : index
    %c0_15 = arith.constant 0 : index
    %12 = vector.load %arg2[%c5, %c0_14, %c0_15] : memref<6x32x32xf32, #tpu.memory_space<vmem>>, vector<1x8x32xf32>
    %13 = vector.shape_cast %12 : vector<1x8x32xf32> to vector<8x32xf32>
    %c0_16 = arith.constant 0 : index
    %c0_17 = arith.constant 0 : index
    %14 = vector.load %arg3[%c0_16, %c0_17] : memref<6x32xf32, #tpu.memory_space<vmem>>, vector<1x32xf32>
    %c1_18 = arith.constant 1 : index
    %c0_19 = arith.constant 0 : index
    %15 = vector.load %arg3[%c1_18, %c0_19] : memref<6x32xf32, #tpu.memory_space<vmem>>, vector<1x32xf32>
    %c2_20 = arith.constant 2 : index
    %c0_21 = arith.constant 0 : index
    %16 = vector.load %arg3[%c2_20, %c0_21] : memref<6x32xf32, #tpu.memory_space<vmem>>, vector<1x32xf32>
    %c3_22 = arith.constant 3 : index
    %c0_23 = arith.constant 0 : index
    %17 = vector.load %arg3[%c3_22, %c0_23] : memref<6x32xf32, #tpu.memory_space<vmem>>, vector<1x32xf32>
    %c4_24 = arith.constant 4 : index
    %c0_25 = arith.constant 0 : index
    %18 = vector.load %arg3[%c4_24, %c0_25] : memref<6x32xf32, #tpu.memory_space<vmem>>, vector<1x32xf32>
    %c5_26 = arith.constant 5 : index
    %c0_27 = arith.constant 0 : index
    %19 = vector.load %arg3[%c5_26, %c0_27] : memref<6x32xf32, #tpu.memory_space<vmem>>, vector<1x32xf32>
    %cst = arith.constant dense<0.000000e+00> : vector<32x32xf32>
    %20 = tpu.matmul %0, %3, %cst {dimension_numbers = #tpu.dot_dimension_numbers<[1], [0], [0], [1], [0, 0, 1, 1], [], []>} : vector<32x16xf32>, vector<16x32xf32>, vector<32x32xf32> -> vector<32x32xf32>
    %21 = vector.broadcast %14 : vector<1x32xf32> to vector<32x32xf32>
    %22 = arith.addf %20, %21 : vector<32x32xf32>
    %cst_28 = arith.constant 0.000000e+00 : f32
    %23 = vector.broadcast %cst_28 : f32 to vector<32x32xf32>
    %24 = arith.maximumf %22, %23 : vector<32x32xf32>
    %cst_29 = arith.constant dense<0.000000e+00> : vector<32x32xf32>
    %25 = tpu.matmul %24, %5, %cst_29 {dimension_numbers = #tpu.dot_dimension_numbers<[1], [0], [0], [1], [0, 0, 1, 1], [], []>} : vector<32x32xf32>, vector<32x32xf32>, vector<32x32xf32> -> vector<32x32xf32>
    %26 = vector.broadcast %15 : vector<1x32xf32> to vector<32x32xf32>
    %27 = arith.addf %25, %26 : vector<32x32xf32>
    %cst_30 = arith.constant dense<0.000000e+00> : vector<32x32xf32>
    %28 = tpu.matmul %27, %7, %cst_30 {dimension_numbers = #tpu.dot_dimension_numbers<[1], [0], [0], [1], [0, 0, 1, 1], [], []>} : vector<32x32xf32>, vector<32x32xf32>, vector<32x32xf32> -> vector<32x32xf32>
    %29 = vector.broadcast %16 : vector<1x32xf32> to vector<32x32xf32>
    %30 = arith.addf %28, %29 : vector<32x32xf32>
    %cst_31 = arith.constant dense<0.000000e+00> : vector<32x32xf32>
    %31 = tpu.matmul %27, %9, %cst_31 {dimension_numbers = #tpu.dot_dimension_numbers<[1], [0], [0], [1], [0, 0, 1, 1], [], []>} : vector<32x32xf32>, vector<32x32xf32>, vector<32x32xf32> -> vector<32x32xf32>
    %32 = vector.broadcast %17 : vector<1x32xf32> to vector<32x32xf32>
    %33 = arith.addf %31, %32 : vector<32x32xf32>
    %cst_32 = arith.constant dense<0.000000e+00> : vector<16x32xf32>
    %34 = tpu.matmul %1, %11, %cst_32 {dimension_numbers = #tpu.dot_dimension_numbers<[1], [0], [0], [1], [0, 0, 1, 1], [], []>} : vector<16x32xf32>, vector<32x32xf32>, vector<16x32xf32> -> vector<16x32xf32>
    %35 = vector.broadcast %18 : vector<1x32xf32> to vector<16x32xf32>
    %36 = arith.addf %34, %35 : vector<16x32xf32>
    %cst_33 = arith.constant 8.000000e+00 : f32
    %37 = math.sqrt %cst_33 : f32
    %cst_34 = arith.constant 1.000000e+00 : f32
    %38 = arith.divf %cst_34, %37 : f32
    %39 = vector.extract_strided_slice %33 {offsets = [0, 0], sizes = [8, 32], strides = [1, 1]} : vector<32x32xf32> to vector<8x32xf32>
    %40 = vector.extract_strided_slice %30 {offsets = [8, 0], sizes = [8, 32], strides = [1, 1]} : vector<32x32xf32> to vector<8x32xf32>
    %41 = vector.extract_strided_slice %36 {offsets = [0, 0], sizes = [8, 32], strides = [1, 1]} : vector<16x32xf32> to vector<8x32xf32>
    %cst_35 = arith.constant 0.000000e+00 : f32
    %42 = vector.broadcast %cst_35 : f32 to vector<8x8xf32>
    %43 = vector.extract_strided_slice %40 {offsets = [0, 0], sizes = [8, 8], strides = [1, 1]} : vector<8x32xf32> to vector<8x8xf32>
    %44 = vector.extract_strided_slice %39 {offsets = [0, 0], sizes = [8, 8], strides = [1, 1]} : vector<8x32xf32> to vector<8x8xf32>
    %45 = vector.extract_strided_slice %41 {offsets = [0, 0], sizes = [8, 8], strides = [1, 1]} : vector<8x32xf32> to vector<8x8xf32>
    %cst_36 = arith.constant dense<0.000000e+00> : vector<8x8xf32>
    %46 = tpu.matmul %43, %44, %cst_36 {dimension_numbers = #tpu.dot_dimension_numbers<[1], [1], [0], [0], [0, 0, 1, 0], [], []>} : vector<8x8xf32>, vector<8x8xf32>, vector<8x8xf32> -> vector<8x8xf32>
    %47 = vector.broadcast %38 : f32 to vector<8x8xf32>
    %48 = arith.mulf %46, %47 : vector<8x8xf32>
    %cst_37 = arith.constant dense<0xFF800000> : vector<8xf32>
    %49 = vector.multi_reduction <maximumf>, %48, %cst_37 [1] : vector<8x8xf32> to vector<8xf32>
    %50 = vector.shape_cast %49 : vector<8xf32> to vector<8x1xf32>
    %51 = vector.broadcast %50 : vector<8x1xf32> to vector<8x8xf32>
    %52 = arith.subf %48, %51 : vector<8x8xf32>
    %53 = math.exp %52 : vector<8x8xf32>
    %cst_38 = arith.constant dense<0.000000e+00> : vector<8xf32>
    %54 = vector.multi_reduction <add>, %53, %cst_38 [1] : vector<8x8xf32> to vector<8xf32>
    %55 = vector.shape_cast %54 : vector<8xf32> to vector<8x1xf32>
    %56 = tpu.reciprocal %55 {approx = true} : vector<8x1xf32> -> vector<8x1xf32>
    %57 = vector.broadcast %56 : vector<8x1xf32> to vector<8x8xf32>
    %58 = arith.mulf %53, %57 : vector<8x8xf32>
    %cst_39 = arith.constant dense<0.000000e+00> : vector<8x8xf32>
    %59 = tpu.matmul %58, %45, %cst_39 {dimension_numbers = #tpu.dot_dimension_numbers<[1], [0], [0], [1], [0, 0, 1, 1], [], []>} : vector<8x8xf32>, vector<8x8xf32>, vector<8x8xf32> -> vector<8x8xf32>
    %60 = arith.addf %42, %59 : vector<8x8xf32>
    %61 = vector.extract_strided_slice %40 {offsets = [0, 8], sizes = [8, 8], strides = [1, 1]} : vector<8x32xf32> to vector<8x8xf32>
    %62 = vector.extract_strided_slice %39 {offsets = [0, 8], sizes = [8, 8], strides = [1, 1]} : vector<8x32xf32> to vector<8x8xf32>
    %63 = vector.extract_strided_slice %41 {offsets = [0, 8], sizes = [8, 8], strides = [1, 1]} : vector<8x32xf32> to vector<8x8xf32>
    %cst_40 = arith.constant dense<0.000000e+00> : vector<8x8xf32>
    %64 = tpu.matmul %61, %62, %cst_40 {dimension_numbers = #tpu.dot_dimension_numbers<[1], [1], [0], [0], [0, 0, 1, 0], [], []>} : vector<8x8xf32>, vector<8x8xf32>, vector<8x8xf32> -> vector<8x8xf32>
    %65 = vector.broadcast %38 : f32 to vector<8x8xf32>
    %66 = arith.mulf %64, %65 : vector<8x8xf32>
    %cst_41 = arith.constant dense<0xFF800000> : vector<8xf32>
    %67 = vector.multi_reduction <maximumf>, %66, %cst_41 [1] : vector<8x8xf32> to vector<8xf32>
    %68 = vector.shape_cast %67 : vector<8xf32> to vector<8x1xf32>
    %69 = vector.broadcast %68 : vector<8x1xf32> to vector<8x8xf32>
    %70 = arith.subf %66, %69 : vector<8x8xf32>
    %71 = math.exp %70 : vector<8x8xf32>
    %cst_42 = arith.constant dense<0.000000e+00> : vector<8xf32>
    %72 = vector.multi_reduction <add>, %71, %cst_42 [1] : vector<8x8xf32> to vector<8xf32>
    %73 = vector.shape_cast %72 : vector<8xf32> to vector<8x1xf32>
    %74 = tpu.reciprocal %73 {approx = true} : vector<8x1xf32> -> vector<8x1xf32>
    %75 = vector.broadcast %74 : vector<8x1xf32> to vector<8x8xf32>
    %76 = arith.mulf %71, %75 : vector<8x8xf32>
    %cst_43 = arith.constant dense<0.000000e+00> : vector<8x8xf32>
    %77 = tpu.matmul %76, %63, %cst_43 {dimension_numbers = #tpu.dot_dimension_numbers<[1], [0], [0], [1], [0, 0, 1, 1], [], []>} : vector<8x8xf32>, vector<8x8xf32>, vector<8x8xf32> -> vector<8x8xf32>
    %78 = arith.addf %60, %77 : vector<8x8xf32>
    %79 = vector.extract_strided_slice %40 {offsets = [0, 16], sizes = [8, 8], strides = [1, 1]} : vector<8x32xf32> to vector<8x8xf32>
    %80 = vector.extract_strided_slice %39 {offsets = [0, 16], sizes = [8, 8], strides = [1, 1]} : vector<8x32xf32> to vector<8x8xf32>
    %81 = vector.extract_strided_slice %41 {offsets = [0, 16], sizes = [8, 8], strides = [1, 1]} : vector<8x32xf32> to vector<8x8xf32>
    %cst_44 = arith.constant dense<0.000000e+00> : vector<8x8xf32>
    %82 = tpu.matmul %79, %80, %cst_44 {dimension_numbers = #tpu.dot_dimension_numbers<[1], [1], [0], [0], [0, 0, 1, 0], [], []>} : vector<8x8xf32>, vector<8x8xf32>, vector<8x8xf32> -> vector<8x8xf32>
    %83 = vector.broadcast %38 : f32 to vector<8x8xf32>
    %84 = arith.mulf %82, %83 : vector<8x8xf32>
    %cst_45 = arith.constant dense<0xFF800000> : vector<8xf32>
    %85 = vector.multi_reduction <maximumf>, %84, %cst_45 [1] : vector<8x8xf32> to vector<8xf32>
    %86 = vector.shape_cast %85 : vector<8xf32> to vector<8x1xf32>
    %87 = vector.broadcast %86 : vector<8x1xf32> to vector<8x8xf32>
    %88 = arith.subf %84, %87 : vector<8x8xf32>
    %89 = math.exp %88 : vector<8x8xf32>
    %cst_46 = arith.constant dense<0.000000e+00> : vector<8xf32>
    %90 = vector.multi_reduction <add>, %89, %cst_46 [1] : vector<8x8xf32> to vector<8xf32>
    %91 = vector.shape_cast %90 : vector<8xf32> to vector<8x1xf32>
    %92 = tpu.reciprocal %91 {approx = true} : vector<8x1xf32> -> vector<8x1xf32>
    %93 = vector.broadcast %92 : vector<8x1xf32> to vector<8x8xf32>
    %94 = arith.mulf %89, %93 : vector<8x8xf32>
    %cst_47 = arith.constant dense<0.000000e+00> : vector<8x8xf32>
    %95 = tpu.matmul %94, %81, %cst_47 {dimension_numbers = #tpu.dot_dimension_numbers<[1], [0], [0], [1], [0, 0, 1, 1], [], []>} : vector<8x8xf32>, vector<8x8xf32>, vector<8x8xf32> -> vector<8x8xf32>
    %96 = arith.addf %78, %95 : vector<8x8xf32>
    %97 = vector.extract_strided_slice %40 {offsets = [0, 24], sizes = [8, 8], strides = [1, 1]} : vector<8x32xf32> to vector<8x8xf32>
    %98 = vector.extract_strided_slice %39 {offsets = [0, 24], sizes = [8, 8], strides = [1, 1]} : vector<8x32xf32> to vector<8x8xf32>
    %99 = vector.extract_strided_slice %41 {offsets = [0, 24], sizes = [8, 8], strides = [1, 1]} : vector<8x32xf32> to vector<8x8xf32>
    %cst_48 = arith.constant dense<0.000000e+00> : vector<8x8xf32>
    %100 = tpu.matmul %97, %98, %cst_48 {dimension_numbers = #tpu.dot_dimension_numbers<[1], [1], [0], [0], [0, 0, 1, 0], [], []>} : vector<8x8xf32>, vector<8x8xf32>, vector<8x8xf32> -> vector<8x8xf32>
    %101 = vector.broadcast %38 : f32 to vector<8x8xf32>
    %102 = arith.mulf %100, %101 : vector<8x8xf32>
    %cst_49 = arith.constant dense<0xFF800000> : vector<8xf32>
    %103 = vector.multi_reduction <maximumf>, %102, %cst_49 [1] : vector<8x8xf32> to vector<8xf32>
    %104 = vector.shape_cast %103 : vector<8xf32> to vector<8x1xf32>
    %105 = vector.broadcast %104 : vector<8x1xf32> to vector<8x8xf32>
    %106 = arith.subf %102, %105 : vector<8x8xf32>
    %107 = math.exp %106 : vector<8x8xf32>
    %cst_50 = arith.constant dense<0.000000e+00> : vector<8xf32>
    %108 = vector.multi_reduction <add>, %107, %cst_50 [1] : vector<8x8xf32> to vector<8xf32>
    %109 = vector.shape_cast %108 : vector<8xf32> to vector<8x1xf32>
    %110 = tpu.reciprocal %109 {approx = true} : vector<8x1xf32> -> vector<8x1xf32>
    %111 = vector.broadcast %110 : vector<8x1xf32> to vector<8x8xf32>
    %112 = arith.mulf %107, %111 : vector<8x8xf32>
    %cst_51 = arith.constant dense<0.000000e+00> : vector<8x8xf32>
    %113 = tpu.matmul %112, %99, %cst_51 {dimension_numbers = #tpu.dot_dimension_numbers<[1], [0], [0], [1], [0, 0, 1, 1], [], []>} : vector<8x8xf32>, vector<8x8xf32>, vector<8x8xf32> -> vector<8x8xf32>
    %114 = arith.addf %96, %113 : vector<8x8xf32>
    %cst_52 = arith.constant dense<0.000000e+00> : vector<8x32xf32>
    %115 = tpu.matmul %114, %13, %cst_52 {dimension_numbers = #tpu.dot_dimension_numbers<[1], [0], [0], [1], [0, 0, 1, 1], [], []>} : vector<8x8xf32>, vector<8x32xf32>, vector<8x32xf32> -> vector<8x32xf32>
    %cst_53 = arith.constant 4.000000e+00 : f32
    %116 = vector.broadcast %cst_53 : f32 to vector<1x32xf32>
    %117 = arith.mulf %116, %19 : vector<1x32xf32>
    %118 = vector.broadcast %117 : vector<1x32xf32> to vector<8x32xf32>
    %119 = arith.addf %115, %118 : vector<8x32xf32>
    %c0_54 = arith.constant 0 : index
    %c0_55 = arith.constant 0 : index
    %120 = vector.load %arg4[%c0_54, %c0_55] : memref<16x32xf32, #tpu.memory_space<vmem>>, vector<8x32xf32>
    tpu.vector_store %arg4[%c0_54, %c0_55], %119 {strides = array<i32>} : memref<16x32xf32, #tpu.memory_space<vmem>>, vector<8x32xf32>,
    %121 = vector.extract_strided_slice %33 {offsets = [16, 0], sizes = [8, 32], strides = [1, 1]} : vector<32x32xf32> to vector<8x32xf32>
    %122 = vector.extract_strided_slice %30 {offsets = [24, 0], sizes = [8, 32], strides = [1, 1]} : vector<32x32xf32> to vector<8x32xf32>
    %123 = vector.extract_strided_slice %36 {offsets = [8, 0], sizes = [8, 32], strides = [1, 1]} : vector<16x32xf32> to vector<8x32xf32>
    %cst_56 = arith.constant 0.000000e+00 : f32
    %124 = vector.broadcast %cst_56 : f32 to vector<8x8xf32>
    %125 = vector.extract_strided_slice %122 {offsets = [0, 0], sizes = [8, 8], strides = [1, 1]} : vector<8x32xf32> to vector<8x8xf32>
    %126 = vector.extract_strided_slice %121 {offsets = [0, 0], sizes = [8, 8], strides = [1, 1]} : vector<8x32xf32> to vector<8x8xf32>
    %127 = vector.extract_strided_slice %123 {offsets = [0, 0], sizes = [8, 8], strides = [1, 1]} : vector<8x32xf32> to vector<8x8xf32>
    %cst_57 = arith.constant dense<0.000000e+00> : vector<8x8xf32>
    %128 = tpu.matmul %125, %126, %cst_57 {dimension_numbers = #tpu.dot_dimension_numbers<[1], [1], [0], [0], [0, 0, 1, 0], [], []>} : vector<8x8xf32>, vector<8x8xf32>, vector<8x8xf32> -> vector<8x8xf32>
    %129 = vector.broadcast %38 : f32 to vector<8x8xf32>
    %130 = arith.mulf %128, %129 : vector<8x8xf32>
    %cst_58 = arith.constant dense<0xFF800000> : vector<8xf32>
    %131 = vector.multi_reduction <maximumf>, %130, %cst_58 [1] : vector<8x8xf32> to vector<8xf32>
    %132 = vector.shape_cast %131 : vector<8xf32> to vector<8x1xf32>
    %133 = vector.broadcast %132 : vector<8x1xf32> to vector<8x8xf32>
    %134 = arith.subf %130, %133 : vector<8x8xf32>
    %135 = math.exp %134 : vector<8x8xf32>
    %cst_59 = arith.constant dense<0.000000e+00> : vector<8xf32>
    %136 = vector.multi_reduction <add>, %135, %cst_59 [1] : vector<8x8xf32> to vector<8xf32>
    %137 = vector.shape_cast %136 : vector<8xf32> to vector<8x1xf32>
    %138 = tpu.reciprocal %137 {approx = true} : vector<8x1xf32> -> vector<8x1xf32>
    %139 = vector.broadcast %138 : vector<8x1xf32> to vector<8x8xf32>
    %140 = arith.mulf %135, %139 : vector<8x8xf32>
    %cst_60 = arith.constant dense<0.000000e+00> : vector<8x8xf32>
    %141 = tpu.matmul %140, %127, %cst_60 {dimension_numbers = #tpu.dot_dimension_numbers<[1], [0], [0], [1], [0, 0, 1, 1], [], []>} : vector<8x8xf32>, vector<8x8xf32>, vector<8x8xf32> -> vector<8x8xf32>
    %142 = arith.addf %124, %141 : vector<8x8xf32>
    %143 = vector.extract_strided_slice %122 {offsets = [0, 8], sizes = [8, 8], strides = [1, 1]} : vector<8x32xf32> to vector<8x8xf32>
    %144 = vector.extract_strided_slice %121 {offsets = [0, 8], sizes = [8, 8], strides = [1, 1]} : vector<8x32xf32> to vector<8x8xf32>
    %145 = vector.extract_strided_slice %123 {offsets = [0, 8], sizes = [8, 8], strides = [1, 1]} : vector<8x32xf32> to vector<8x8xf32>
    %cst_61 = arith.constant dense<0.000000e+00> : vector<8x8xf32>
    %146 = tpu.matmul %143, %144, %cst_61 {dimension_numbers = #tpu.dot_dimension_numbers<[1], [1], [0], [0], [0, 0, 1, 0], [], []>} : vector<8x8xf32>, vector<8x8xf32>, vector<8x8xf32> -> vector<8x8xf32>
    %147 = vector.broadcast %38 : f32 to vector<8x8xf32>
    %148 = arith.mulf %146, %147 : vector<8x8xf32>
    %cst_62 = arith.constant dense<0xFF800000> : vector<8xf32>
    %149 = vector.multi_reduction <maximumf>, %148, %cst_62 [1] : vector<8x8xf32> to vector<8xf32>
    %150 = vector.shape_cast %149 : vector<8xf32> to vector<8x1xf32>
    %151 = vector.broadcast %150 : vector<8x1xf32> to vector<8x8xf32>
    %152 = arith.subf %148, %151 : vector<8x8xf32>
    %153 = math.exp %152 : vector<8x8xf32>
    %cst_63 = arith.constant dense<0.000000e+00> : vector<8xf32>
    %154 = vector.multi_reduction <add>, %153, %cst_63 [1] : vector<8x8xf32> to vector<8xf32>
    %155 = vector.shape_cast %154 : vector<8xf32> to vector<8x1xf32>
    %156 = tpu.reciprocal %155 {approx = true} : vector<8x1xf32> -> vector<8x1xf32>
    %157 = vector.broadcast %156 : vector<8x1xf32> to vector<8x8xf32>
    %158 = arith.mulf %153, %157 : vector<8x8xf32>
    %cst_64 = arith.constant dense<0.000000e+00> : vector<8x8xf32>
    %159 = tpu.matmul %158, %145, %cst_64 {dimension_numbers = #tpu.dot_dimension_numbers<[1], [0], [0], [1], [0, 0, 1, 1], [], []>} : vector<8x8xf32>, vector<8x8xf32>, vector<8x8xf32> -> vector<8x8xf32>
    %160 = arith.addf %142, %159 : vector<8x8xf32>
    %161 = vector.extract_strided_slice %122 {offsets = [0, 16], sizes = [8, 8], strides = [1, 1]} : vector<8x32xf32> to vector<8x8xf32>
    %162 = vector.extract_strided_slice %121 {offsets = [0, 16], sizes = [8, 8], strides = [1, 1]} : vector<8x32xf32> to vector<8x8xf32>
    %163 = vector.extract_strided_slice %123 {offsets = [0, 16], sizes = [8, 8], strides = [1, 1]} : vector<8x32xf32> to vector<8x8xf32>
    %cst_65 = arith.constant dense<0.000000e+00> : vector<8x8xf32>
    %164 = tpu.matmul %161, %162, %cst_65 {dimension_numbers = #tpu.dot_dimension_numbers<[1], [1], [0], [0], [0, 0, 1, 0], [], []>} : vector<8x8xf32>, vector<8x8xf32>, vector<8x8xf32> -> vector<8x8xf32>
    %165 = vector.broadcast %38 : f32 to vector<8x8xf32>
    %166 = arith.mulf %164, %165 : vector<8x8xf32>
    %cst_66 = arith.constant dense<0xFF800000> : vector<8xf32>
    %167 = vector.multi_reduction <maximumf>, %166, %cst_66 [1] : vector<8x8xf32> to vector<8xf32>
    %168 = vector.shape_cast %167 : vector<8xf32> to vector<8x1xf32>
    %169 = vector.broadcast %168 : vector<8x1xf32> to vector<8x8xf32>
    %170 = arith.subf %166, %169 : vector<8x8xf32>
    %171 = math.exp %170 : vector<8x8xf32>
    %cst_67 = arith.constant dense<0.000000e+00> : vector<8xf32>
    %172 = vector.multi_reduction <add>, %171, %cst_67 [1] : vector<8x8xf32> to vector<8xf32>
    %173 = vector.shape_cast %172 : vector<8xf32> to vector<8x1xf32>
    %174 = tpu.reciprocal %173 {approx = true} : vector<8x1xf32> -> vector<8x1xf32>
    %175 = vector.broadcast %174 : vector<8x1xf32> to vector<8x8xf32>
    %176 = arith.mulf %171, %175 : vector<8x8xf32>
    %cst_68 = arith.constant dense<0.000000e+00> : vector<8x8xf32>
    %177 = tpu.matmul %176, %163, %cst_68 {dimension_numbers = #tpu.dot_dimension_numbers<[1], [0], [0], [1], [0, 0, 1, 1], [], []>} : vector<8x8xf32>, vector<8x8xf32>, vector<8x8xf32> -> vector<8x8xf32>
    %178 = arith.addf %160, %177 : vector<8x8xf32>
    %179 = vector.extract_strided_slice %122 {offsets = [0, 24], sizes = [8, 8], strides = [1, 1]} : vector<8x32xf32> to vector<8x8xf32>
    %180 = vector.extract_strided_slice %121 {offsets = [0, 24], sizes = [8, 8], strides = [1, 1]} : vector<8x32xf32> to vector<8x8xf32>
    %181 = vector.extract_strided_slice %123 {offsets = [0, 24], sizes = [8, 8], strides = [1, 1]} : vector<8x32xf32> to vector<8x8xf32>
    %cst_69 = arith.constant dense<0.000000e+00> : vector<8x8xf32>
    %182 = tpu.matmul %179, %180, %cst_69 {dimension_numbers = #tpu.dot_dimension_numbers<[1], [1], [0], [0], [0, 0, 1, 0], [], []>} : vector<8x8xf32>, vector<8x8xf32>, vector<8x8xf32> -> vector<8x8xf32>
    %183 = vector.broadcast %38 : f32 to vector<8x8xf32>
    %184 = arith.mulf %182, %183 : vector<8x8xf32>
    %cst_70 = arith.constant dense<0xFF800000> : vector<8xf32>
    %185 = vector.multi_reduction <maximumf>, %184, %cst_70 [1] : vector<8x8xf32> to vector<8xf32>
    %186 = vector.shape_cast %185 : vector<8xf32> to vector<8x1xf32>
    %187 = vector.broadcast %186 : vector<8x1xf32> to vector<8x8xf32>
    %188 = arith.subf %184, %187 : vector<8x8xf32>
    %189 = math.exp %188 : vector<8x8xf32>
    %cst_71 = arith.constant dense<0.000000e+00> : vector<8xf32>
    %190 = vector.multi_reduction <add>, %189, %cst_71 [1] : vector<8x8xf32> to vector<8xf32>
    %191 = vector.shape_cast %190 : vector<8xf32> to vector<8x1xf32>
    %192 = tpu.reciprocal %191 {approx = true} : vector<8x1xf32> -> vector<8x1xf32>
    %193 = vector.broadcast %192 : vector<8x1xf32> to vector<8x8xf32>
    %194 = arith.mulf %189, %193 : vector<8x8xf32>
    %cst_72 = arith.constant dense<0.000000e+00> : vector<8x8xf32>
    %195 = tpu.matmul %194, %181, %cst_72 {dimension_numbers = #tpu.dot_dimension_numbers<[1], [0], [0], [1], [0, 0, 1, 1], [], []>} : vector<8x8xf32>, vector<8x8xf32>, vector<8x8xf32> -> vector<8x8xf32>
    %196 = arith.addf %178, %195 : vector<8x8xf32>
    %cst_73 = arith.constant dense<0.000000e+00> : vector<8x32xf32>
    %197 = tpu.matmul %196, %13, %cst_73 {dimension_numbers = #tpu.dot_dimension_numbers<[1], [0], [0], [1], [0, 0, 1, 1], [], []>} : vector<8x8xf32>, vector<8x32xf32>, vector<8x32xf32> -> vector<8x32xf32>
    %cst_74 = arith.constant 4.000000e+00 : f32
    %198 = vector.broadcast %cst_74 : f32 to vector<1x32xf32>
    %199 = arith.mulf %198, %19 : vector<1x32xf32>
    %200 = vector.broadcast %199 : vector<1x32xf32> to vector<8x32xf32>
    %201 = arith.addf %197, %200 : vector<8x32xf32>
    %c8 = arith.constant 8 : index
    %c0_75 = arith.constant 0 : index
    %202 = vector.load %arg4[%c8, %c0_75] : memref<16x32xf32, #tpu.memory_space<vmem>>, vector<8x32xf32>
    tpu.vector_store %arg4[%c8, %c0_75], %201 {strides = array<i32>} : memref<16x32xf32, #tpu.memory_space<vmem>>, vector<8x32xf32>,
    return
  }
}

</mosaic_0001>

<bundles_post_ra>
// kernel: tpu_custom_call.1
= control target key start
LH: loop header
LB: loop body
LE: loop exit
PB: predicated region body
PF: predicated region fallthrough
CT: control target
= control target key end

     0   :  { %9 = vsyncpa [#allocation3], 0  ;;  %s1176_s0 = inlined_call_operand.vmem [shape: f32[32,16], index: 0, kind: input, shape index: {}]   ;;  %s1177_s1 = inlined_call_operand.vmem [shape: f32[16,32], index: 1, kind: input, shape index: {}]   ;;  %s1178_s2 = inlined_call_operand.hbm [shape: f32[6,32,32], index: 2, kind: input, shape index: {}]   ;;  %s1179_s3 = inlined_call_operand.vmem [shape: f32[6,32], index: 3, kind: input, shape index: {}]   ;;  %s1180_s4 = inlined_call_operand.hbm [shape: f32[16,32], index: 4, kind: output, shape index: {}]  }
   0x1   :  { %10 = vsyncpa [#allocation4], 0  ;;  %s19_s17 = sshll.u32 %s1178_s2, 4  ;;  %s992_s18 = smov [#allocation2]   ;;  %s20_s17 = int_to_ptr.hbm [resolvable:$true] %s19_s17 }
   0x2   :  { %s21_s19 = sshll.u32 %s992_s18, 4  ;;  %s993_s20 = smov 128   ;;  %s22_s19 = int_to_ptr.vmem [resolvable:$true] %s21_s19 }
   0x3   :  { %s994_s21 = smov 8  }
   0x4   :  { %27 = dma.hbm_to_vmem [thread:$0]  %s20_s17, 3072, %s22_s19, [#allocation3], %s993_s20, %s993_s20, %s994_s21  }
   0x5   :  { %988 = dma.done.wait [#allocation3], 3072  }
   0x6   :  { %989 = vsyncadd [#allocation3], 4294964224  ;;  %v41_v0 = vld [vmem:[#allocation2 + $0x8] sm:$0xff]  ;;  %v40_v1 = vld [vmem:[#allocation2] sm:$0xff]  ;;  %vm71_vm0 = vcmask 130048   ;;  %vm118_vm1 = vcmask 261120  }
   0x7   :  { %98 = vmatpush.msra.mxu0 %v41_v0  ;;  %v34_v2 = vld [vmem:[%s1176_s0] sm:$0xff]  ;;  %v46_v3 = vld [vmem:[#allocation2 + $0x38] sm:$0xff]  ;;  %v35_v4 = vld [vmem:[%s1176_s0 + $0x8] sm:$0xff]  ;;  %vm258_vm2 = vcmask 64512   ;;  %s995_s8 = smov 104   ;;  %s996_s9 = smov 112  }
   0x8   :  { %143 = vmatpush.msra.mxu1 %v46_v3  ;;  %v36_v5 = vld [vmem:[%s1176_s0 + $0x10] sm:$0xff]  ;;  %v37_v6 = vld [vmem:[%s1176_s0 + $0x18] sm:$0xff]  ;;  %v44_v8 = vld [vmem:[#allocation2 + $0x28] sm:$0xff]  ;;  %s997_s10 = smov 120   ;;  %s839_s24 = sshll.u32 %s1180_s4, 4  ;;  %s840_s24 = int_to_ptr.hbm [resolvable:$true] %s839_s24 }
   0x9   :  { %99 = vmatpush.msra.mxu0 %v40_v1  ;;  %v45_v7 = vld [vmem:[#allocation2 + $0x30] sm:$0xff]  ;;  %v43_v9 = vld [vmem:[#allocation2 + $0x20] sm:$0xff]  ;;  %v51_v11 = vld [vmem:[#allocation2 + $0x58] sm:$0xff] }
   0xa   :  { %852 = vmatmul.msk.f32.vlgmr.msra.gmra.mxu0 %vm71_vm0, %v34_v2  ;;  %144 = vmatpush.msra.mxu1 %v45_v7  ;;  %v903_v10 = vld [vmem:[%s1179_s3] ss:$0 sm:$0xff]  ;;  %v56_v12 = vld [vmem:[#allocation2 + $0x78] sm:$0xff]  ;;  %v50_v13 = vld [vmem:[#allocation2 + $0x50] sm:$0xff] }
   0xb   :  { %185 = vmatpush.msra.mxu2 %v51_v11  ;;  %213 = vmatpush.msra.mxu3 %v56_v12  ;;  %v55_v14 = vld [vmem:[#allocation2 + $0x70] sm:$0xff]  ;;  %v49_v27 = vld [vmem:[#allocation2 + $0x48] sm:$0xff]  ;;  %v48_v29 = vld [vmem:[#allocation2 + $0x40] sm:$0xff] }
   0xc   :  { %145 = vmatpush.msra.mxu1 %v44_v8  ;;  %v54_v28 = vld [vmem:[#allocation2 + $0x68] sm:$0xff]  ;;  %v53_v30 = vld [vmem:[#allocation2 + $0x60] sm:$0xff]  ;;  %v61_v40 = vld [vmem:[#allocation2 + $0x98] sm:$0xff] }
   0xd   :  { %186 = vmatpush.msra.mxu2 %v50_v13  ;;  %214 = vmatpush.msra.mxu3 %v55_v14  ;;  %v904_v31 = vld [vmem:[%s1179_s3 + $0x1] ss:$0 sm:$0xff]  ;;  %v60_v41 = vld [vmem:[#allocation2 + $0x90] sm:$0xff]  ;;  %v905_v42 = vld [vmem:[%s1179_s3 + $0x3] ss:$0 sm:$0xff] }
   0xe   :  { %146 = vmatpush.msra.mxu1 %v43_v9  ;;  %247 = vmatpush.msrb.mxu0 %v61_v40  ;;  %v59_v43 = vld [vmem:[#allocation2 + $0x88] sm:$0xff]  ;;  %v58_v44 = vld [vmem:[#allocation2 + $0x80] sm:$0xff] }
   0xf   :  { %187 = vmatpush.msra.mxu2 %v49_v27  ;;  %215 = vmatpush.msra.mxu3 %v54_v28  ;;  %v906_v48 = vld [vmem:[%s1179_s3 + $0x2] ss:$0 sm:$0xff]  ;;  %v39_v59 = vld [vmem:[%s1177_s1 + $0x8] sm:$0xff]  ;;  %v907_v7 = vld [vmem:[%s1179_s3 + $0x4] ss:$0 sm:$0xff] }
  0x10   :  { %248 = vmatpush.msrb.mxu0 %v60_v41  ;;  %v38_v58 = vld [vmem:[%s1177_s1] sm:$0xff] }
  0x11   :  { %188 = vmatpush.msra.mxu2 %v48_v29  ;;  %216 = vmatpush.msra.mxu3 %v53_v30  ;;  %v1109_v12 = vld [vmem:[#allocation2 + $0xa0] sm:$0xff] }
  0x12   :  { %853 = vmatmul.msk.f32.gmra.mxu0 %vm71_vm0, %v35_v4 }
  0x13   :  { %249 = vmatpush.msrb.mxu0 %v59_v43 }
  0x15   :  { %250 = vmatpush.msrb.mxu0 %v58_v44 }
  0x1a   :  { %854 = vmatmul.msk.f32.gmra.mxu0 %vm71_vm0, %v36_v5 }
  0x22   :  { %855 = vmatmul.msk.f32.gmra.mxu0 %vm71_vm0, %v37_v6 }
  0x2a   :  { %868 = vmatmul.msk.f32.vlgmr.msrb.gmra.mxu0 %vm118_vm1, %v38_v58 }
  0x32   :  { %869 = vmatmul.msk.f32.gmra.mxu0 %vm118_vm1, %v39_v59 }
  0x87   :  { %v101_v15 = vpop.f32.mrf.mxu0 }
  0x88   :  { %v102_v16 = vadd.f32 %v903_v10, %v101_v15 }
  0x8a   :  { %v113_v17 = vmax.f32 %v102_v16, 0.0 }
  0x8c   :  { %856 = vmatmul.msk.f32.vlgmr.msra.gmra.mxu1 %vm118_vm1, %v113_v17 }
  0x8f   :  { %v104_v18 = vpop.f32.mrf.mxu0 }
  0x90   :  { %v105_v19 = vadd.f32 %v903_v10, %v104_v18 }
  0x92   :  { %v114_v20 = vmax.f32 %v105_v19, 0.0 }
  0x94   :  { %857 = vmatmul.msk.f32.gmra.mxu1 %vm118_vm1, %v114_v20 }
  0x97   :  { %v107_v21 = vpop.f32.mrf.mxu0 }
  0x98   :  { %v108_v22 = vadd.f32 %v903_v10, %v107_v21 }
  0x9a   :  { %v115_v23 = vmax.f32 %v108_v22, 0.0 }
  0x9c   :  { %858 = vmatmul.msk.f32.gmra.mxu1 %vm118_vm1, %v115_v23 }
  0x9f   :  { %v110_v24 = vpop.f32.mrf.mxu0 }
  0xa0   :  { %v111_v25 = vadd.f32 %v903_v10, %v110_v24 }
  0xa2   :  { %v116_v26 = vmax.f32 %v111_v25, 0.0 }
  0xa4   :  { %859 = vmatmul.msk.f32.gmra.mxu1 %vm118_vm1, %v116_v26 }
  0xa7   :  { %v252_v8 = vpop.f32.mrf.mxu0 }
  0xa8   :  { %v1102_v9 = vadd.f32 %v907_v7, %v252_v8 }
  0xaf   :  { %v255_v10 = vpop.f32.mrf.mxu0 }
  0xb0   :  { %v1107_v11 = vadd.f32 %v907_v7, %v255_v10 }
 0x109   :  { %v148_v32 = vpop.f32.mrf.mxu1 }
 0x10a   :  { %v149_v33 = vadd.f32 %v904_v31, %v148_v32 }
 0x10c   :  { %860 = vmatmul.msk.f32.vlgmr.msra.gmra.mxu2 %vm118_vm1, %v149_v33  ;;  %864 = vmatmul.msk.f32.vlgmr.msra.gmra.mxu3 %vm118_vm1, %v149_v33 }
 0x111   :  { %v151_v34 = vpop.f32.mrf.mxu1 }
 0x112   :  { %v152_v35 = vadd.f32 %v904_v31, %v151_v34 }
 0x114   :  { %861 = vmatmul.msk.f32.gmra.mxu2 %vm118_vm1, %v152_v35  ;;  %865 = vmatmul.msk.f32.gmra.mxu3 %vm118_vm1, %v152_v35 }
 0x119   :  { %v154_v36 = vpop.f32.mrf.mxu1 }
 0x11a   :  { %v155_v37 = vadd.f32 %v904_v31, %v154_v36 }
 0x11c   :  { %862 = vmatmul.msk.f32.gmra.mxu2 %vm118_vm1, %v155_v37  ;;  %866 = vmatmul.msk.f32.gmra.mxu3 %vm118_vm1, %v155_v37 }
 0x121   :  { %v157_v38 = vpop.f32.mrf.mxu1 }
 0x122   :  { %v158_v39 = vadd.f32 %v904_v31, %v157_v38 }
 0x124   :  { %863 = vmatmul.msk.f32.gmra.mxu2 %vm118_vm1, %v158_v39  ;;  %867 = vmatmul.msk.f32.gmra.mxu3 %vm118_vm1, %v158_v39 }
 0x18f   :  { %v190_v45 = vpop.f32.mrf.mxu2  ;;  %v218_v46 = vpop.f32.mrf.mxu3 }
 0x190   :  { %v219_v47 = vadd.f32 %v905_v42, %v218_v46 }
 0x192   :  { %456 = vrot.lane.b32.xlu2 %v219_v47, %s995_s8  ;;  %389 = vrot.lane.b32.xlu1 %v219_v47, %s996_s9 }
 0x193   :  { %299 = vrot.lane.b32.xlu0 %v219_v47, %s997_s10  ;;  %870 = vmatpush.xpose.msk.msrb.mxu1 %vm258_vm2, %v219_v47 }
 0x197   :  { %v192_v49 = vpop.f32.mrf.mxu2  ;;  %v221_v50 = vpop.f32.mrf.mxu3  ;;  %382 = vmatpush.msra.mxu1 %v1102_v9 }
 0x198   :  { %v193_v51 = vadd.f32 %v906_v48, %v192_v49 }
 0x19a   :  { %871 = vmatmul.msk.f32.vlgmr.msrb.gmra.mxu1 %vm258_vm2, %v193_v51  ;;  %387 = vrot.lane.b32.xlu1 %v193_v51, %s996_s9 }
 0x19b   :  { %297 = vrot.lane.b32.xlu0 %v193_v51, %s997_s10  ;;  %454 = vrot.lane.b32.xlu2 %v193_v51, %s995_s8 }
 0x19f   :  { %v195_v52 = vpop.f32.mrf.mxu2  ;;  %v223_v53 = vpop.f32.mrf.mxu3 }
 0x1a0   :  { %v1074_v54 = vadd.f32 %v905_v42, %v223_v53 }
 0x1a3   :  { %587 = vrot.lane.b32.xlu0 %v1074_v54, %s997_s10 }
 0x1a7   :  { %v197_v55 = vpop.f32.mrf.mxu2  ;;  %v226_v56 = vpop.f32.mrf.mxu3 }
 0x1a8   :  { %v1078_v57 = vadd.f32 %v906_v48, %v197_v55 }
 0x1aa   :  { %585 = vrot.lane.b32.xlu1 %v1078_v57, %s997_s10 }
 0x1ec   :  { %v457_v60 = vpop.permute.xlu2 %456 }
 0x1ed   :  { %879 = vmatpush.xpose.msk.msra.mxu0 %vm258_vm2, %v457_v60 }
 0x1f5   :  { %v455_v61 = vpop.permute.xlu2 %454 }
 0x1f6   :  { %880 = vmatmul.msk.f32.vlgmr.msra.gmra.mxu0 %vm258_vm2, %v455_v61 }
 0x204   :  { %v390_v62 = vpop.permute.xlu1 %389 }
 0x205   :  { %v300_v63 = vpop.permute.xlu0 %299 }
 0x206   :  { %872 = vmatpush.xpose.msk.msrb.mxu2 %vm258_vm2, %v300_v63 }
 0x20a   :  { %876 = vmatpush.xpose.msk.msra.mxu2 %vm258_vm2, %v390_v62 }
 0x20c   :  { %v388_v1 = vpop.permute.xlu1 %387 }
 0x20d   :  { %v298_v0 = vpop.permute.xlu0 %297 }
 0x20e   :  { %873 = vmatmul.msk.f32.vlgmr.msrb.gmra.mxu2 %vm258_vm2, %v298_v0 }
 0x20f   :  { %541 = vmatpush.msrb.mxu2 %v1109_v12 }
 0x215   :  { %v588_v2 = vpop.permute.xlu0 %587 }
 0x216   :  { %877 = vmatmul.msk.f32.vlgmr.msra.gmra.mxu2 %vm258_vm2, %v388_v1  ;;  %885 = vmatpush.xpose.msk.msrb.mxu0 %vm258_vm2, %v588_v2 }
 0x217   :  { %v282_v3 = vpop.f32.mrf.mxu1  ;;  %670 = vmatpush.msra.mxu2 %v1107_v11 }
 0x218   :  { %v285_v4 = vmul.f32 0.35355338, %v282_v3 }
 0x21a   :  { %v286_v5 = vsel %vm258_vm2, %v285_v4, -inf }
 0x21b   :  { %287 = vmax.xlane.f32.xlu0 %v286_v5 }
 0x21c   :  { %v586_v6 = vpop.permute.xlu1 %585 }
 0x21d   :  { %886 = vmatmul.msk.f32.vlgmr.msrb.gmra.mxu0 %vm258_vm2, %v586_v6 }
 0x22f   :  { %338 = vrot.lane.b32.xlu0 %v1102_v9, %s997_s10 }
 0x273   :  { %v479_v16 = vpop.f32.mrf.mxu0 }
 0x274   :  { %v482_v20 = vmul.f32 0.35355338, %v479_v16 }
 0x276   :  { %v483_v25 = vsel %vm258_vm2, %v482_v20, -inf }
 0x28e   :  { %v288_v13 = vpop.xlane.xlu0 %287 }
 0x28f   :  { %v289_v17 = vsub.f32 %v285_v4, %v288_v13 }
 0x291   :  { %v322_v14 = vpop.f32.mrf.mxu2  ;;  %v290_v19 = vmul.f32 1.442695, %v289_v17 }
 0x292   :  { %v325_v15 = vmul.f32 0.35355338, %v322_v14 }
 0x293   :  { %908 = vpow2.f32 %v290_v19 }
 0x294   :  { %v326_v18 = vsel %vm258_vm2, %v325_v15, -inf }
 0x295   :  { %327 = vmax.xlane.f32.xlu2 %v326_v18 }
 0x299   :  { %v412_v21 = vpop.f32.mrf.mxu2  ;;  %v909_v27 = vpop.eup %908 }
 0x29a   :  { %v415_v22 = vmul.f32 0.35355338, %v412_v21  ;;  %v610_v23 = vpop.f32.mrf.mxu0  ;;  %v292_v29 = vsel %vm258_vm2, %v909_v27, 0.0 }
 0x29b   :  { %v613_v26 = vmul.f32 0.35355338, %v610_v23 }
 0x29c   :  { %v416_v24 = vsel %vm258_vm2, %v415_v22, -inf }
 0x29d   :  { %417 = vmax.xlane.f32.xlu1 %v416_v24  ;;  %484 = vmax.xlane.f32.xlu2 %v483_v25  ;;  %v614_v28 = vsel %vm258_vm2, %v613_v26, -inf }
 0x2a1   :  { %v339_v30 = vpop.permute.xlu0 %338 }
 0x2a2   :  { %359 = vmatpush.msrb.mxu3 %v339_v30 }
 0x2a5   :  { %615 = vmax.xlane.f32.xlu2 %v614_v28  ;;  %293 = vadd.xlane.f32.xlu1 %v292_v29 }
 0x2bd   :  { %427 = vrot.lane.b32.xlu2 %v1102_v9, %s996_s9 }
 0x308   :  { %v328_v31 = vpop.xlane.xlu2 %327 }
 0x309   :  { %v329_v32 = vsub.f32 %v325_v15, %v328_v31 }
 0x30b   :  { %v330_v33 = vmul.f32 1.442695, %v329_v32 }
 0x30d   :  { %910 = vpow2.f32 %v330_v33 }
 0x310   :  { %v418_v34 = vpop.xlane.xlu1 %417  ;;  %v485_v35 = vpop.xlane.xlu2 %484 }
 0x311   :  { %v419_v36 = vsub.f32 %v415_v22, %v418_v34  ;;  %v486_v37 = vsub.f32 %v482_v20, %v485_v35  ;;  %v69_v35 = vld [vmem:[%s1179_s3 + $0x5] sm:$0x1]  ;;  %s998_s3 = smov [#allocation5]  }
 0x312   :  { %s837_s22 = sshll.u32 %s998_s3, 4  ;;  %s838_s22 = int_to_ptr.vmem [resolvable:$true] %s837_s22 }
 0x313   :  { %v911_v38 = vpop.eup %910  ;;  %v420_v39 = vmul.f32 1.442695, %v419_v36  ;;  %v487_v40 = vmul.f32 1.442695, %v486_v37  ;;  %v521_v36 = vmul.f32 4.0, %v69_v35 }
 0x314   :  { %v332_v41 = vsel %vm258_vm2, %v911_v38, 0.0 }
 0x315   :  { %912 = vpow2.f32 %v420_v39  ;;  %333 = vadd.xlane.f32.xlu0 %v332_v41  ;;  %v522_v39 = vperm.slane %v521_v36, 0 }
 0x316   :  { %914 = vpow2.f32 %v487_v40 }
 0x318   :  { %v616_v42 = vpop.xlane.xlu2 %615  ;;  %v294_v43 = vpop.xlane.xlu1 %293 }
 0x319   :  { %v617_v44 = vsub.f32 %v613_v26, %v616_v42  ;;  %916 = vrcp.f32 %v294_v43 }
 0x31b   :  { %v913_v45 = vpop.eup %912  ;;  %v618_v46 = vmul.f32 1.442695, %v617_v44 }
 0x31c   :  { %v915_v47 = vpop.eup %914  ;;  %v422_v48 = vsel %vm258_vm2, %v913_v45, 0.0 }
 0x31d   :  { %918 = vpow2.f32 %v618_v46  ;;  %423 = vadd.xlane.f32.xlu2 %v422_v48  ;;  %v489_v49 = vsel %vm258_vm2, %v915_v47, 0.0 }
 0x31e   :  { %490 = vadd.xlane.f32.xlu1 %v489_v49 }
 0x31f   :  { %v917_v50 = vpop.eup %916 }
 0x320   :  { %v296_v51 = vmul.f32 %v917_v50, %v909_v27  ;;  %v428_v52 = vpop.permute.xlu2 %427 }
 0x321   :  { %448 = vmatpush.msra.mxu3 %v428_v52 }
 0x322   :  { %875 = vmatmul.msk.f32.vlgmr.msra.gmra.mxu1 %vm258_vm2, %v296_v51 }
 0x323   :  { %v919_v53 = vpop.eup %918 }
 0x324   :  { %v620_v55 = vsel %vm258_vm2, %v919_v53, 0.0 }
 0x326   :  { %621 = vadd.xlane.f32.xlu1 %v620_v55 }
 0x329   :  { %626 = vrot.lane.b32.xlu0 %v1107_v11, %s997_s10 }
 0x331   :  { %677 = vrot.lane.b32.xlu0 %v1074_v54, %s996_s9 }
 0x335   :  { %744 = vrot.lane.b32.xlu2 %v1074_v54, %s995_s8 }
 0x339   :  { %675 = vrot.lane.b32.xlu0 %v1078_v57, %s996_s9 }
 0x33d   :  { %742 = vrot.lane.b32.xlu2 %v1078_v57, %s995_s8 }
 0x33f   :  { %494 = vrot.lane.b32.xlu1 %v1102_v9, %s995_s8 }
 0x388   :  { %v334_v56 = vpop.xlane.xlu0 %333 }
 0x389   :  { %920 = vrcp.f32 %v334_v56 }
 0x38f   :  { %v921_v58 = vpop.eup %920 }
 0x390   :  { %v424_v59 = vpop.xlane.xlu2 %423  ;;  %v336_v60 = vmul.f32 %v921_v58, %v911_v38 }
 0x391   :  { %922 = vrcp.f32 %v424_v59  ;;  %v491_v0 = vpop.xlane.xlu1 %490 }
 0x392   :  { %874 = vmatmul.msk.f32.vlgmr.msrb.gmra.mxu3 %vm258_vm2, %v336_v60  ;;  %924 = vrcp.f32 %v491_v0 }
 0x393   :  { %883 = vmatpush.xpose.msk.msrb.mxu3 %vm258_vm2, %v1074_v54 }
 0x397   :  { %v923_v61 = vpop.eup %922 }
 0x398   :  { %v426_v62 = vmul.f32 %v923_v61, %v913_v45  ;;  %v925_v54 = vpop.eup %924  ;;  %v745_v6 = vpop.permute.xlu2 %744 }
 0x399   :  { %v622_v2 = vpop.xlane.xlu1 %621  ;;  %v493_v4 = vmul.f32 %v925_v54, %v915_v47 }
 0x39a   :  { %878 = vmatmul.msk.f32.vlgmr.msra.gmra.mxu3 %vm258_vm2, %v426_v62  ;;  %926 = vrcp.f32 %v622_v2 }
 0x39b   :  { %v627_v63 = vpop.permute.xlu0 %626 }
 0x39f   :  { %v384_v14 = vpop.f32.mrf.mxu1 }
 0x3a0   :  { %v743_v8 = vpop.permute.xlu2 %742 }
 0x3a2   :  { %884 = vmatmul.msk.f32.vlgmr.msrb.gmra.mxu3 %vm258_vm2, %v1078_v57  ;;  %v927_v57 = vpop.eup %926 }
 0x3a3   :  { %v678_v1 = vpop.permute.xlu0 %677  ;;  %v624_v7 = vmul.f32 %v927_v57, %v919_v53 }
 0x3a4   :  { %889 = vmatpush.xpose.msk.msra.mxu3 %vm258_vm2, %v678_v1 }
 0x3a8   :  { %827 = vmatpush.msrb.mxu3 %v1109_v12 }
 0x3ab   :  { %v676_v3 = vpop.permute.xlu0 %675 }
 0x3ac   :  { %890 = vmatmul.msk.f32.vlgmr.msra.gmra.mxu3 %vm258_vm2, %v676_v3 }
 0x3b1   :  { %v495_v5 = vpop.permute.xlu1 %494 }
 0x3b2   :  { %515 = vmatpush.msrb.mxu1 %v495_v5 }
 0x3b3   :  { %881 = vmatmul.msk.f32.vlgmr.msrb.gmra.mxu1 %vm258_vm2, %v493_v4 }
 0x3b4   :  { %647 = vmatpush.msra.mxu1 %v627_v63 }
 0x3b6   :  { %892 = vmatpush.xpose.msk.msrb.mxu1 %vm258_vm2, %v745_v6 }
 0x3bb   :  { %887 = vmatmul.msk.f32.vlgmr.msra.gmra.mxu1 %vm258_vm2, %v624_v7 }
 0x3c3   :  { %893 = vmatmul.msk.f32.vlgmr.msrb.gmra.mxu1 %vm258_vm2, %v743_v8 }
 0x415   :  { %v361_v9 = vpop.f32.mrf.mxu3 }
 0x416   :  { %v385_v16 = vadd.f32 %v384_v14, %v361_v9 }
 0x41d   :  { %v450_v10 = vpop.f32.mrf.mxu3 }
 0x41e   :  { %v453_v17 = vadd.f32 %v450_v10, %v385_v16 }
 0x425   :  { %v570_v12 = vpop.f32.mrf.mxu3 }
 0x426   :  { %v573_v13 = vmul.f32 0.35355338, %v570_v12 }
 0x428   :  { %v574_v15 = vsel %vm258_vm2, %v573_v13, -inf }
 0x429   :  { %575 = vmax.xlane.f32.xlu1 %v574_v15 }
 0x42f   :  { %v700_v18 = vpop.f32.mrf.mxu3 }
 0x430   :  { %v517_v19 = vpop.f32.mrf.mxu1  ;;  %v703_v20 = vmul.f32 0.35355338, %v700_v18 }
 0x431   :  { %v520_v21 = vadd.f32 %v517_v19, %v453_v17 }
 0x432   :  { %v704_v22 = vsel %vm258_vm2, %v703_v20, -inf }
 0x433   :  { %882 = vmatmul.msk.f32.vlgmr.msrb.gmra.mxu2 %vm258_vm2, %v520_v21  ;;  %705 = vmax.xlane.f32.xlu2 %v704_v22 }
 0x438   :  { %v649_v23 = vpop.f32.mrf.mxu1 }
 0x440   :  { %v767_v24 = vpop.f32.mrf.mxu1 }
 0x441   :  { %v770_v25 = vmul.f32 0.35355338, %v767_v24 }
 0x443   :  { %v771_v26 = vsel %vm258_vm2, %v770_v25, -inf }
 0x444   :  { %772 = vmax.xlane.f32.xlu0 %v771_v26 }
 0x49c   :  { %v576_v27 = vpop.xlane.xlu1 %575 }
 0x49d   :  { %v577_v28 = vsub.f32 %v573_v13, %v576_v27 }
 0x49f   :  { %v578_v29 = vmul.f32 1.442695, %v577_v28 }
 0x4a1   :  { %928 = vpow2.f32 %v578_v29 }
 0x4a6   :  { %v706_v30 = vpop.xlane.xlu2 %705 }
 0x4a7   :  { %v929_v31 = vpop.eup %928  ;;  %v707_v32 = vsub.f32 %v703_v20, %v706_v30 }
 0x4a8   :  { %v580_v33 = vsel %vm258_vm2, %v929_v31, 0.0 }
 0x4a9   :  { %v708_v34 = vmul.f32 1.442695, %v707_v32  ;;  %581 = vadd.xlane.f32.xlu1 %v580_v33 }
 0x4ab   :  { %930 = vpow2.f32 %v708_v34 }
 0x4b1   :  { %v931_v37 = vpop.eup %930 }
 0x4b2   :  { %v710_v38 = vsel %vm258_vm2, %v931_v37, 0.0 }
 0x4b3   :  { %711 = vadd.xlane.f32.xlu2 %v710_v38 }
 0x4b6   :  { %v543_v40 = vpop.f32.mrf.mxu2 }
 0x4b7   :  { %v544_v41 = vadd.f32 %v543_v40, %v522_v39  ;;  %v773_v42 = vpop.xlane.xlu0 %772 }
 0x4b8   :  { %v774_v43 = vsub.f32 %v770_v25, %v773_v42 }
 0x4b9   :  { %546 = vst.msk [vmem:[#allocation5] sm:$0xff] %vm118_vm1, %v544_v41 }
 0x4ba   :  { %v775_v44 = vmul.f32 1.442695, %v774_v43 }
 0x4bc   :  { %932 = vpow2.f32 %v775_v44 }
 0x4c2   :  { %v933_v45 = vpop.eup %932  ;;  %782 = vrot.lane.b32.xlu1 %v1107_v11, %s995_s8 }
 0x4c3   :  { %v777_v46 = vsel %vm258_vm2, %v933_v45, 0.0 }
 0x4c4   :  { %778 = vadd.xlane.f32.xlu0 %v777_v46 }
 0x4d8   :  { %715 = vrot.lane.b32.xlu0 %v1107_v11, %s996_s9 }
 0x51c   :  { %v582_v47 = vpop.xlane.xlu1 %581 }
 0x51d   :  { %934 = vrcp.f32 %v582_v47 }
 0x523   :  { %v935_v48 = vpop.eup %934 }
 0x524   :  { %v584_v49 = vmul.f32 %v935_v48, %v929_v31 }
 0x526   :  { %888 = vmatmul.msk.f32.vlgmr.msra.gmra.mxu2 %vm258_vm2, %v584_v49  ;;  %v712_v53 = vpop.xlane.xlu2 %711 }
 0x534   :  { %v783_v50 = vpop.permute.xlu1 %782 }
 0x535   :  { %803 = vmatpush.msrb.mxu2 %v783_v50 }
 0x537   :  { %v779_v51 = vpop.xlane.xlu0 %778 }
 0x538   :  { %936 = vrcp.f32 %v779_v51 }
 0x539   :  { %938 = vrcp.f32 %v712_v53 }
 0x53e   :  { %v937_v52 = vpop.eup %936 }
 0x53f   :  { %v781_v55 = vmul.f32 %v937_v52, %v933_v45  ;;  %v939_v56 = vpop.eup %938 }
 0x540   :  { %v714_v58 = vmul.f32 %v939_v56, %v931_v37 }
 0x541   :  { %894 = vmatmul.msk.f32.vlgmr.msrb.gmra.mxu2 %vm258_vm2, %v781_v55 }
 0x54a   :  { %v716_v59 = vpop.permute.xlu0 %715 }
 0x54b   :  { %736 = vmatpush.msra.mxu0 %v716_v59 }
 0x54c   :  { %891 = vmatmul.msk.f32.vlgmr.msra.gmra.mxu0 %vm258_vm2, %v714_v58 }
 0x5a9   :  { %v672_v11 = vpop.f32.mrf.mxu2 }
 0x5aa   :  { %v673_v60 = vadd.f32 %v672_v11, %v649_v23 }
 0x5c4   :  { %v805_v63 = vpop.f32.mrf.mxu2 }
 0x5c9   :  { %v738_v61 = vpop.f32.mrf.mxu0 }
 0x5ca   :  { %v741_v62 = vadd.f32 %v738_v61, %v673_v60 }
 0x5cc   :  { %v808_v0 = vadd.f32 %v805_v63, %v741_v62 }
 0x5ce   :  { %895 = vmatmul.msk.f32.vlgmr.msrb.gmra.mxu3 %vm258_vm2, %v808_v0 }
 0x651   :  { %v829_v1 = vpop.f32.mrf.mxu3 }
 0x652   :  { %v830_v2 = vadd.f32 %v829_v1, %v522_v39 }
 0x654   :  { %832 = vst.msk [vmem:[#allocation5 + $0x8] sm:$0xff] %vm118_vm1, %v830_v2 }
 0x655   :  { %845 = dma.vmem_to_hbm [thread:$0]  %s838_s22, 256, %s840_s24, [#allocation4], %s993_s20, %s993_s20, %s994_s21  }
 0x656   :  { %990 = dma.done.wait [#allocation4], 256  }
 0x657   :  { %991 = vsyncadd [#allocation4], 4294967040 }
 0x658   :  { %850 = vsyncpa [#allocation3], 1 }
 0x659   :  { %851 = vsyncpa [#allocation4], 1 }

</bundles_post_ra>
